<compile_context>
chip_gen: v7x
topology: tpu7x:2x2x1
jax: 0.10.0
libtpu: 0.0.40
codegen_flags: <defaults>
</compile_context>

<pallas_src>
import functools

import jax
import jax.numpy as jnp
from jax import lax
from jax.experimental import pallas as pl
from jax.experimental.pallas import tpu as pltpu


# ---------------------------------------------------------------------------
# Kernel
# ---------------------------------------------------------------------------
def _gdu_kernel(x_ref, v_ref, vsq_ref, w_ref, off_ref, o_ref,
                xv_acc, xsq_acc, *, inv):
    # x_ref   : (TILE_B, TILE_F)  streamed x chunk (native dtype)
    # v_ref   : (TILE_F, D_total) stacked bases, pre-scaled by -2*inv = 1/sigma^2
    # vsq_ref : (1, D_total)      inv * ||v_d||^2 (from the stored V values)
    # w_ref   : (D_total, G)      per-GDU combine matrix (means + similarity folded)
    # off_ref : (1, G)            per-GDU additive offset (1 + mean(k_VV) for MMD)
    # o_ref   : (TILE_B, G)       beta output tile (written at the last F step)
    # xv_acc  : (TILE_B, D_total) f32 scratch, accumulates x @ V_scaled over F chunks
    # xsq_acc : (TILE_B, 1)       f32 scratch, accumulates ||x||^2 over F chunks
    k = pl.program_id(1)

    @pl.when(k == 0)
    def _():
        xv_acc[...] = jnp.zeros_like(xv_acc)
        xsq_acc[...] = jnp.zeros_like(xsq_acc)

    x = x_ref[...]
    # Cross term on the MXU in the streamed dtype; V already carries the
    # -2*inv factor so no extra VPU multiply on the (TILE_B, D_total) result.
    xv_acc[...] += lax.dot_general(
        x, v_ref[...],
        dimension_numbers=(((1,), (0,)), ((), ())),
        preferred_element_type=jnp.float32,
    )
    xsq_acc[...] += jnp.sum(jnp.square(x.astype(jnp.float32)),
                            axis=1, keepdims=True)

    @pl.when(k == pl.num_programs(1) - 1)
    def _():
        # arg = inv * ||x - v||^2 <= 0; the clamp of the squared distance at 0
        # flips to a min at 0 because inv < 0 (guards cancellation).
        arg = jnp.minimum(xsq_acc[...] * inv + xv_acc[...] + vsq_ref[...], 0.0)
        k_xv = jnp.exp(arg)
        beta = jnp.dot(k_xv, w_ref[...],
                       preferred_element_type=jnp.float32) + off_ref[...]
        o_ref[...] = beta.astype(o_ref.dtype)


# ---------------------------------------------------------------------------
# Tile planning
# ---------------------------------------------------------------------------
def _round_up(n, m):
    return ((n + m - 1) // m) * m


@functools.lru_cache(maxsize=None)
def _vmem_plan():
    """Returns (vmem_limit_bytes, total_tile_budget_bytes) per TPU generation."""
    mib = 1024 * 1024
    try:
        phys = int(pltpu.get_tpu_info().vmem_capacity_bytes)
    except Exception:
        # Unknown generation: stay at the v6e scoped default; still far above
        # what small problems need and safe on every chip.
        return 32 * mib, 16 * mib
    # v5e/v6e report ~128 MiB (-> limit 96 MiB), v7x ~64 MiB/TC (-> 48 MiB).
    limit = max(min(phys * 3 // 4, 96 * mib), 32 * mib)
    budget = max(limit // 2, 12 * mib)
    return limit, budget


def _plan_tiles(batch, feat, itemsize, d_total, g):
    """Choose (tile_b, tile_f, vmem_limit_bytes) for the streamed dtype/shapes."""
    vmem_limit, budget = _vmem_plan()
    sub = 8 if itemsize >= 4 else 16          # sublane multiple of streamed dtype
    lane = 128
    d_lanes = _round_up(max(d_total, 1), lane)
    g_lanes = _round_up(max(g, 1), lane)

    # Per-batch-row VMEM cost that does not depend on the feature chunk width:
    # xv accumulator + exp/intermediate headroom, ||x||^2 accumulator, output x2.
    row_fixed = 3 * d_lanes * 4 + lane * 4 + 2 * g_lanes * 4
    const_bytes = 4 * (2 * d_lanes + g_lanes + d_lanes * g_lanes)   # vsq/W/offset

    def bytes_per_row(tf):
        # x chunk (double-buffered) + f32 square intermediate headroom + fixed.
        return 2 * tf * itemsize + 4 * tf + row_fixed

    def resident_bytes(tf):
        # Stacked-basis block (double-buffered by the default pipeline) + consts.
        return 2 * tf * d_lanes * itemsize + const_bytes

    # Feature axis: keep F in one block unless even the minimum-height full-F
    # tile would overflow the budget; then chunk F in multiples of 128 and
    # accumulate across chunks (grid axis 1, "arbitrary").
    tile_f = feat
    if feat > lane and sub * bytes_per_row(feat) + resident_bytes(feat) > budget:
        tf = budget - sub * row_fixed - const_bytes
        tf = tf // (sub * (2 * itemsize + 4) + 2 * d_lanes * itemsize)
        tile_f = max((tf // lane) * lane, lane)

    # Batch axis: as many rows as the budget allows (kernel is HBM-bound), but
    # keep >= ~8 grid steps when the batch is large enough (pipeline overlap,
    # balanced "parallel" axis on the v7x megacore), preferring an even count.
    avail = budget - resident_bytes(tile_f)
    tile_b = max(avail // bytes_per_row(tile_f), sub)
    tile_b = max((tile_b // sub) * sub, sub)
    if batch > sub:
        target_steps = min(8, pl.cdiv(batch, sub))
        tile_b = min(tile_b, _round_up(pl.cdiv(batch, target_steps), sub))
        n_b = pl.cdiv(batch, tile_b)
        if n_b > 1 and n_b % 2 == 1:
            tile_b = max(_round_up(pl.cdiv(batch, n_b + 1), sub), sub)
    if tile_b >= batch:
        tile_b = batch                        # single block == full dim (legal)
    return int(tile_b), int(tile_f), int(vmem_limit)


# ---------------------------------------------------------------------------
# V-only precompute (hoisted out of the hot loop)
# ---------------------------------------------------------------------------
def _precompute_gdu_constants(bases, sigma, similarity, stream_dtype):
    """Returns (v_scaled (F, Dt), v_sq (1, Dt), W (Dt, G), offset (1, G)).

    v_scaled carries the -2*inv = 1/sigma^2 factor; v_sq carries the inv factor
    and is computed from the values actually stored in v_scaled so the
    ||x||^2 - 2 x.v + ||v||^2 expansion stays self-consistent for bf16 streams.
    """
    inv = -1.0 / (2.0 * float(sigma) ** 2)
    scale = -2.0 * inv                                      # = 1/sigma^2 > 0

    v_stacked = jnp.concatenate([b.astype(jnp.float32) for b in bases], axis=1)
    d_total = v_stacked.shape[1]

    v_scaled = (v_stacked * scale).astype(stream_dtype)     # (F, D_total)
    v_eff = v_scaled.astype(jnp.float32) / scale            # V as the MXU sees it
    v_sq = inv * jnp.sum(jnp.square(v_eff), axis=0, keepdims=True)   # (1, D_total)

    cols, offs = [], []
    d_off = 0
    for v in bases:
        v = v.astype(jnp.float32)
        d = v.shape[1]
        # k(V, V): tiny (D, D) work, done once outside the kernel.
        diff = v[:, :, None] - v[:, None, :]                 # (F, D, D)
        k_vv = jnp.exp(jnp.sum(jnp.square(diff), axis=0) * inv)

        if similarity == "MMD":
            # beta = k_xx(=1) - 2*mean(k_xv) + mean(k_vv)
            col_scale = jnp.asarray(-2.0 / d, jnp.float32)
            off = 1.0 + jnp.mean(k_vv)
        elif similarity == "CS":
            # beta = mean(k_xv) / (sqrt(k_xx)=1 * mean(sqrt(k_vv)))
            col_scale = (1.0 / d) / jnp.mean(jnp.sqrt(k_vv))
            off = jnp.asarray(0.0, jnp.float32)
        elif similarity == "Projected":
            col_scale = (1.0 / d) / jnp.mean(k_vv)
            off = jnp.asarray(0.0, jnp.float32)
        else:
            raise ValueError(f"unknown similarity_measure_name: {similarity}")

        col = jnp.zeros((d_total,), jnp.float32).at[d_off:d_off + d].set(col_scale)
        cols.append(col)
        offs.append(jnp.asarray(off, jnp.float32))
        d_off += d

    w = jnp.stack(cols, axis=1)                              # (D_total, G)
    offset = jnp.stack(offs)[None, :]                        # (1, G)
    return v_scaled, v_sq, w, offset


# ---------------------------------------------------------------------------
# Public entry points
# ---------------------------------------------------------------------------
def gdu_forward_fused(x_tilde, bases, *, sigma, similarity_measure_name,
                      tile_b=None, tile_f=None):
    """Fused GDU layer: x_tilde (B, F), bases = list of (F, D_g) -> betas (B, G)."""
    B, F = x_tilde.shape
    inv = -1.0 / (2.0 * float(sigma) ** 2)
    stream_dtype = x_tilde.dtype
    itemsize = jnp.dtype(stream_dtype).itemsize

    v_scaled, v_sq, w, offset = _precompute_gdu_constants(
        bases, sigma, similarity_measure_name, stream_dtype)
    D_total, G = w.shape

    auto_b, auto_f, vmem_limit = _plan_tiles(B, F, itemsize, D_total, G)
    tile_b = auto_b if tile_b is None else int(tile_b)
    tile_f = auto_f if tile_f is None else int(tile_f)
    assert tile_f == F or tile_f % 128 == 0, "tile_f must be F or a multiple of 128"
    assert tile_b == B or tile_b % 8 == 0, "tile_b must be B or a multiple of 8"

    # Zero-pad the feature axis only when it is split into several chunks that
    # do not divide evenly (zero features are exact no-ops for ||x||^2 and x.v).
    n_f = pl.cdiv(F, tile_f)
    f_pad = tile_f * n_f
    if f_pad != F:
        x_tilde = jnp.pad(x_tilde, ((0, 0), (0, f_pad - F)))
        v_scaled = jnp.pad(v_scaled, ((0, f_pad - F), (0, 0)))
    n_b = pl.cdiv(B, tile_b)   # ragged batch edge handled by partial blocks

    kernel = functools.partial(_gdu_kernel, inv=inv)
    out = pl.pallas_call(
        kernel,
        out_shape=jax.ShapeDtypeStruct((B, G), jnp.float32),
        grid=(n_b, n_f),
        in_specs=[
            pl.BlockSpec((tile_b, tile_f), lambda i, k: (i, k)),    # streamed x chunk
            pl.BlockSpec((tile_f, D_total), lambda i, k: (k, 0)),   # stacked basis chunk
            pl.BlockSpec((1, D_total), lambda i, k: (0, 0)),        # inv * ||v||^2
            pl.BlockSpec((D_total, G), lambda i, k: (0, 0)),        # combine matrix
            pl.BlockSpec((1, G), lambda i, k: (0, 0)),              # offsets
        ],
        out_specs=pl.BlockSpec((tile_b, G), lambda i, k: (i, 0)),
        scratch_shapes=[
            pltpu.VMEM((tile_b, D_total), jnp.float32),             # x@V accumulator
            pltpu.VMEM((tile_b, 1), jnp.float32),                   # ||x||^2 accumulator
        ],
        compiler_params=pltpu.CompilerParams(
            dimension_semantics=("parallel", "arbitrary"),
            vmem_limit_bytes=vmem_limit,
        ),
    )(x_tilde, v_scaled, v_sq, w, offset)
    return out


def gdu_forward(x_tilde, domain_basis, *, sigma, similarity_measure_name):
    """Single GDU (matches the torch module): x (B, F), basis (F, D) -> beta (B,)."""
    out = gdu_forward_fused(
        x_tilde, [domain_basis],
        sigma=sigma, similarity_measure_name=similarity_measure_name)
    return out[:, 0]


def make_domain_basis(key, gdu_num, feature_vector_size, domain_dim):
    # Matches torch.normal(mean = gdu_num*0.5*(-1)**gdu_num, std = (gdu_num+1)*0.1)
    mean = gdu_num * 0.5 * ((-1.0) ** gdu_num)
    std = (gdu_num + 1) * 0.1
    return mean + std * jax.random.normal(
        key, (feature_vector_size, domain_dim), dtype=jnp.float32)


# ---------------------------------------------------------------------------
# Pure-JAX reference mirroring the torch broadcasting semantics
# ---------------------------------------------------------------------------
def _reference(x, v, sigma, similarity):
    xb = x[:, :, None]                                                # (B, F, 1)
    vb = v[None, :, :]                                                # (1, F, D)
    inv = -1.0 / (2.0 * sigma ** 2)
    k_xx = jnp.exp(jnp.sum(jnp.square(xb - xb), axis=1) * inv)[:, 0]  # (B,)
    k_xv = jnp.exp(jnp.sum(jnp.square(xb - vb), axis=1) * inv)        # (B, D)
    v_perm = jnp.transpose(v[None], (2, 1, 0))                        # (D, F, 1)
    k_vv = jnp.exp(jnp.sum(jnp.square(v_perm - vb), axis=1) * inv)    # (D, D)
    if similarity == "MMD":
        return k_xx - 2.0 * jnp.mean(k_xv, axis=1) + jnp.mean(k_vv)
    elif similarity == "CS":
        return jnp.mean(k_xv, axis=1) / (jnp.sqrt(k_xx) * jnp.mean(jnp.sqrt(k_vv)))
    else:
        return jnp.mean(k_xv, axis=1) / jnp.mean(k_vv)


if __name__ == "__main__":
    batch = 8
    feature_vector_size = 32
    domain_dim = 4
    sigma = 7.5

    key = jax.random.PRNGKey(0)
    k_x, k_v0, k_v1, k_v2, k_x2 = jax.random.split(key, 5)
    x_tilde = jax.random.normal(k_x, (batch, feature_vector_size), dtype=jnp.float32)

    # Single-GDU path (matches the torch module) for all three similarity measures.
    basis2 = make_domain_basis(k_v0, 2, feature_vector_size, domain_dim)
    for sim in ("MMD", "CS", "Projected"):
        beta = gdu_forward(x_tilde, basis2, sigma=sigma, similarity_measure_name=sim)
        beta = jax.block_until_ready(beta)
        ref = _reference(x_tilde, basis2, sigma, sim)
        assert beta.shape == (batch,)
        assert jnp.allclose(beta, ref, atol=5e-5, rtol=5e-5), sim

    # Fused multi-GDU path: all bases stacked, x read from HBM once.
    bases = [
        make_domain_basis(k_v0, 1, feature_vector_size, domain_dim),
        make_domain_basis(k_v1, 2, feature_vector_size, domain_dim),
        make_domain_basis(k_v2, 3, feature_vector_size, domain_dim),
    ]
    betas = gdu_forward_fused(x_tilde, bases, sigma=sigma,
                              similarity_measure_name="MMD")
    betas = jax.block_until_ready(betas)
    assert betas.shape == (batch, len(bases))
    for g, v in enumerate(bases):
        ref_g = _reference(x_tilde, v, sigma, "MMD")
        assert jnp.allclose(betas[:, g], ref_g, atol=5e-5, rtol=5e-5)

    # Exercise the 2-D grid (feature-chunk accumulation) and a ragged batch
    # edge by forcing small tiles on a wider problem.
    b2, f2 = 20, 256
    x2 = jax.random.normal(k_x2, (b2, f2), dtype=jnp.float32)
    bases2 = [
        make_domain_basis(k_v1, 1, f2, 4),
        make_domain_basis(k_v2, 3, f2, 6),
    ]
    betas2 = gdu_forward_fused(x2, bases2, sigma=sigma,
                               similarity_measure_name="MMD",
                               tile_b=8, tile_f=128)
    betas2 = jax.block_until_ready(betas2)
    assert betas2.shape == (b2, len(bases2))
    for g, v in enumerate(bases2):
        ref_g = _reference(x2, v, sigma, "MMD")
        assert jnp.allclose(betas2[:, g], ref_g, atol=5e-5, rtol=5e-5)

    print("KERNEL_OK")
</pallas_src>

<mosaic_0001>
module attributes {stable_mosaic.version = 11 : i64} {
  func.func @_gdu_kernel(%arg0: i32, %arg1: i32, %arg2: memref<8x32xf32, #tpu.memory_space<vmem>>, %arg3: memref<32x4xf32, #tpu.memory_space<vmem>>, %arg4: memref<1x4xf32, #tpu.memory_space<vmem>>, %arg5: memref<4x1xf32, #tpu.memory_space<vmem>>, %arg6: memref<1x1xf32, #tpu.memory_space<vmem>>, %arg7: memref<8x1xf32, #tpu.memory_space<vmem>>, %arg8: memref<8x4xf32, #tpu.memory_space<vmem>>, %arg9: memref<8x1xf32, #tpu.memory_space<vmem>>) attributes {dimension_semantics = [#tpu.dimension_semantics<parallel>, #tpu.dimension_semantics<arbitrary>], iteration_bounds = array<i64: 1, 1>, scalar_prefetch = 0 : i64, scratch_operands = 2 : i64, tpu.core_type = #tpu.core_type<tc>, window_params = [{transform_indices = @transform_0, window_bounds = array<i64: 8, 32>}, {transform_indices = @transform_1, window_bounds = array<i64: 32, 4>}, {pipeline_mode = #tpu.pipeline_mode<synchronous>, transform_indices = @transform_2, window_bounds = array<i64: 1, 4>}, {pipeline_mode = #tpu.pipeline_mode<synchronous>, transform_indices = @transform_3, window_bounds = array<i64: 4, 1>}, {pipeline_mode = #tpu.pipeline_mode<synchronous>, transform_indices = @transform_4, window_bounds = array<i64: 1, 1>}, {transform_indices = @transform_5, window_bounds = array<i64: 8, 1>}]} {
    %c0_i32 = arith.constant 0 : i32
    %0 = arith.cmpi eq, %arg1, %c0_i32 : i32
    %1 = arith.extui %0 : i1 to i32
    %c0_i32_0 = arith.constant 0 : i32
    %2 = arith.cmpi ne, %1, %c0_i32_0 : i32
    scf.if %2 {
      %cst_15 = arith.constant 0.000000e+00 : f32
      %18 = vector.broadcast %cst_15 : f32 to vector<8x4xf32>
      %c0_16 = arith.constant 0 : index
      %c0_17 = arith.constant 0 : index
      %19 = vector.load %arg8[%c0_16, %c0_17] : memref<8x4xf32, #tpu.memory_space<vmem>>, vector<8x4xf32>
      tpu.vector_store %arg8[%c0_16, %c0_17], %18 {strides = array<i32>} : memref<8x4xf32, #tpu.memory_space<vmem>>, vector<8x4xf32>,
      %cst_18 = arith.constant 0.000000e+00 : f32
      %20 = vector.broadcast %cst_18 : f32 to vector<8x1xf32>
      %c0_19 = arith.constant 0 : index
      %c0_20 = arith.constant 0 : index
      %21 = vector.load %arg9[%c0_19, %c0_20] : memref<8x1xf32, #tpu.memory_space<vmem>>, vector<8x1xf32>
      tpu.vector_store %arg9[%c0_19, %c0_20], %20 {strides = array<i32>} : memref<8x1xf32, #tpu.memory_space<vmem>>, vector<8x1xf32>,
    } else {
    }
    %c0 = arith.constant 0 : index
    %c0_1 = arith.constant 0 : index
    %3 = vector.load %arg2[%c0, %c0_1] : memref<8x32xf32, #tpu.memory_space<vmem>>, vector<8x32xf32>
    %c0_2 = arith.constant 0 : index
    %c0_3 = arith.constant 0 : index
    %4 = vector.load %arg8[%c0_2, %c0_3] : memref<8x4xf32, #tpu.memory_space<vmem>>, vector<8x4xf32>
    %c0_4 = arith.constant 0 : index
    %c0_5 = arith.constant 0 : index
    %5 = vector.load %arg3[%c0_4, %c0_5] : memref<32x4xf32, #tpu.memory_space<vmem>>, vector<32x4xf32>
    %cst = arith.constant dense<0.000000e+00> : vector<8x4xf32>
    %6 = tpu.matmul %3, %5, %cst {dimension_numbers = #tpu.dot_dimension_numbers<[1], [0], [0], [1], [0, 0, 1, 1], [], []>} : vector<8x32xf32>, vector<32x4xf32>, vector<8x4xf32> -> vector<8x4xf32>
    %7 = arith.addf %4, %6 : vector<8x4xf32>
    %c0_6 = arith.constant 0 : index
    %c0_7 = arith.constant 0 : index
    %8 = vector.load %arg8[%c0_6, %c0_7] : memref<8x4xf32, #tpu.memory_space<vmem>>, vector<8x4xf32>
    tpu.vector_store %arg8[%c0_6, %c0_7], %7 {strides = array<i32>} : memref<8x4xf32, #tpu.memory_space<vmem>>, vector<8x4xf32>,
    %c0_8 = arith.constant 0 : index
    %c0_9 = arith.constant 0 : index
    %9 = vector.load %arg9[%c0_8, %c0_9] : memref<8x1xf32, #tpu.memory_space<vmem>>, vector<8x1xf32>
    %10 = arith.mulf %3, %3 : vector<8x32xf32>
    %cst_10 = arith.constant dense<0.000000e+00> : vector<8xf32>
    %11 = vector.multi_reduction <add>, %10, %cst_10 [1] : vector<8x32xf32> to vector<8xf32>
    %12 = vector.shape_cast %11 : vector<8xf32> to vector<8x1xf32>
    %13 = arith.addf %9, %12 : vector<8x1xf32>
    %c0_11 = arith.constant 0 : index
    %c0_12 = arith.constant 0 : index
    %14 = vector.load %arg9[%c0_11, %c0_12] : memref<8x1xf32, #tpu.memory_space<vmem>>, vector<8x1xf32>
    tpu.vector_store %arg9[%c0_11, %c0_12], %13 {strides = array<i32>} : memref<8x1xf32, #tpu.memory_space<vmem>>, vector<8x1xf32>,
    %c0_i32_13 = arith.constant 0 : i32
    %15 = arith.cmpi eq, %arg1, %c0_i32_13 : i32
    %16 = arith.extui %15 : i1 to i32
    %c0_i32_14 = arith.constant 0 : i32
    %17 = arith.cmpi ne, %16, %c0_i32_14 : i32
    scf.if %17 {
      %c0_15 = arith.constant 0 : index
      %c0_16 = arith.constant 0 : index
      %18 = vector.load %arg9[%c0_15, %c0_16] : memref<8x1xf32, #tpu.memory_space<vmem>>, vector<8x1xf32>
      %cst_17 = arith.constant -0.0088888891 : f32
      %19 = vector.broadcast %cst_17 : f32 to vector<8x1xf32>
      %20 = arith.mulf %18, %19 : vector<8x1xf32>
      %c0_18 = arith.constant 0 : index
      %c0_19 = arith.constant 0 : index
      %21 = vector.load %arg8[%c0_18, %c0_19] : memref<8x4xf32, #tpu.memory_space<vmem>>, vector<8x4xf32>
      %22 = vector.broadcast %20 : vector<8x1xf32> to vector<8x4xf32>
      %23 = arith.addf %22, %21 : vector<8x4xf32>
      %c0_20 = arith.constant 0 : index
      %c0_21 = arith.constant 0 : index
      %24 = vector.load %arg4[%c0_20, %c0_21] : memref<1x4xf32, #tpu.memory_space<vmem>>, vector<1x4xf32>
      %25 = vector.broadcast %24 : vector<1x4xf32> to vector<8x4xf32>
      %26 = arith.addf %23, %25 : vector<8x4xf32>
      %cst_22 = arith.constant 0.000000e+00 : f32
      %27 = vector.broadcast %cst_22 : f32 to vector<8x4xf32>
      %28 = arith.minimumf %26, %27 : vector<8x4xf32>
      %29 = math.exp %28 : vector<8x4xf32>
      %c0_23 = arith.constant 0 : index
      %c0_24 = arith.constant 0 : index
      %30 = vector.load %arg5[%c0_23, %c0_24] : memref<4x1xf32, #tpu.memory_space<vmem>>, vector<4x1xf32>
      %cst_25 = arith.constant dense<0.000000e+00> : vector<8x1xf32>
      %31 = tpu.matmul %29, %30, %cst_25 {dimension_numbers = #tpu.dot_dimension_numbers<[1], [0], [0], [1], [0, 0, 1, 1], [], []>} : vector<8x4xf32>, vector<4x1xf32>, vector<8x1xf32> -> vector<8x1xf32>
      %c0_26 = arith.constant 0 : index
      %c0_27 = arith.constant 0 : index
      %32 = vector.load %arg6[%c0_26, %c0_27] : memref<1x1xf32, #tpu.memory_space<vmem>>, vector<1x1xf32>
      %33 = vector.broadcast %32 : vector<1x1xf32> to vector<8x1xf32>
      %34 = arith.addf %31, %33 : vector<8x1xf32>
      %c0_28 = arith.constant 0 : index
      %c0_29 = arith.constant 0 : index
      %35 = vector.load %arg7[%c0_28, %c0_29] : memref<8x1xf32, #tpu.memory_space<vmem>>, vector<8x1xf32>
      tpu.vector_store %arg7[%c0_28, %c0_29], %34 {strides = array<i32>} : memref<8x1xf32, #tpu.memory_space<vmem>>, vector<8x1xf32>,
    } else {
    }
    return
  }
  func.func @transform_0(%arg0: i32, %arg1: i32) -> (i32, i32) {
    %c0_i32 = arith.constant 0 : i32
    return %arg0, %arg1 : i32, i32
  }
  func.func @transform_1(%arg0: i32, %arg1: i32) -> (i32, i32) {
    %c0_i32 = arith.constant 0 : i32
    %c0_i32_0 = arith.constant 0 : i32
    return %arg1, %c0_i32 : i32, i32
  }
  func.func @transform_2(%arg0: i32, %arg1: i32) -> (i32, i32) {
    %c0_i32 = arith.constant 0 : i32
    %c0_i32_0 = arith.constant 0 : i32
    %c0_i32_1 = arith.constant 0 : i32
    return %c0_i32, %c0_i32_0 : i32, i32
  }
  func.func @transform_3(%arg0: i32, %arg1: i32) -> (i32, i32) {
    %c0_i32 = arith.constant 0 : i32
    %c0_i32_0 = arith.constant 0 : i32
    %c0_i32_1 = arith.constant 0 : i32
    return %c0_i32, %c0_i32_0 : i32, i32
  }
  func.func @transform_4(%arg0: i32, %arg1: i32) -> (i32, i32) {
    %c0_i32 = arith.constant 0 : i32
    %c0_i32_0 = arith.constant 0 : i32
    %c0_i32_1 = arith.constant 0 : i32
    return %c0_i32, %c0_i32_0 : i32, i32
  }
  func.func @transform_5(%arg0: i32, %arg1: i32) -> (i32, i32) {
    %c0_i32 = arith.constant 0 : i32
    %c0_i32_0 = arith.constant 0 : i32
    return %arg0, %c0_i32 : i32, i32
  }
}

</mosaic_0001>

<bundles_post_ra>
// kernel: tpu_custom_call.1
= control target key start
LH: loop header
LB: loop body
LE: loop exit
PB: predicated region body
PF: predicated region fallthrough
CT: control target
= control target key end

     0   :  { %vm36_vm0 = vcmask 261120   ;;  %v275_v1 = vmov 0.0|0.0   ;;  %vm276_vm1 = vmmov 0   ;;  %v277_v4 = vmov 0.0   ;;  %s344_s0 = inlined_call_operand.vmem [shape: f32[8,32], index: 0, kind: input, shape index: {}]   ;;  %s345_s1 = inlined_call_operand.vmem [shape: f32[32,4], index: 1, kind: input, shape index: {}]   ;;  %s346_s3 = inlined_call_operand.vmem [shape: f32[4,1], index: 3, kind: input, shape index: {}]   ;;  %s347_s4 = inlined_call_operand.<no memory space> [shape: f32[1,1], index: 4, kind: input, shape index: {}]   ;;  %s348_s2 = inlined_call_operand.vmem [shape: f32[1,4], index: 2, kind: input, shape index: {}]   ;;  %s349_s5 = inlined_call_operand.vmem [shape: f32[8,1], index: 5, kind: output, shape index: {}]  }
   0x1   :  { %v30_v0 = vld [vmem:[%s344_s0] sm:$0xff]  ;;  %262 = vmatprep.subr.bf16.mxu0 %v275_v1  ;;  %v33_v3 = vld [vmem:[%s345_s1 + $0x8] sm:$0xff]  ;;  %254 = vmatprep.mubr.msk.f32.mxu0 %vm276_vm1, %v277_v4  ;;  %vm28_vm2 = vcmask 7168   ;;  %v34_v7 = vld [vmem:[%s345_s1 + $0x10] sm:$0xff]  ;;  %v278_v11 = vmov 0   ;;  %vm26_vm3 = vcmask 31744   ;;  %v10_v18 = vstv %s347_s4 }
   0x2   :  { %v32_v2 = vld [vmem:[%s345_s1] sm:$0xff]  ;;  %v114_v5 = vmul.f32 %v30_v0, %v30_v0  ;;  %v35_v8 = vld [vmem:[%s345_s1 + $0x18] sm:$0xff]  ;;  %29 = vst.msk [vmem:[#allocation3] sm:$0xff] %vm28_vm2, %v277_v4  ;;  %257 = vmatprep.subr.mxu1 %v277_v4  ;;  %259 = vmatprep.mubr.msk.f32.mxu1 %vm276_vm1, %v277_v4  ;;  %vm155_vm4 = vcmask 1043456   ;;  %11 = vst [vmem:[#allocation4] sm:$0x1] %v10_v18 }
   0x3   :  { %v263_v6 = vpack.c.bf16 %v33_v3, %v32_v2  ;;  %v266_v10 = vpack.c.bf16 %v35_v8, %v34_v7  ;;  %272 = vset.pattern.permute.xlu0 %v278_v11  ;;  %27 = vst.msk [vmem:[#allocation2] sm:$0xff] %vm26_vm3, %v277_v4  ;;  %v144_v17 = vld [vmem:[%s346_s3] sm:$0xf] }
   0x4   :  { %v115_v9 = vsel %vm36_vm0, %v114_v5, 0.0  ;;  %258 = vmatpush3.msk.msra.mxu1 %vm155_vm4, %v144_v17  ;;  %v235_v24 = vld [vmem:[%s348_s2] ss:$0 sm:$0xff] }
   0x5   :  { %264 = vmatpush3.bf16.msra.mxu0 %v263_v6  ;;  %116 = vadd.xlane.f32.xlu0 %v115_v9 }
   0x6   :  { %265 = vmatprep.subr.bf16.mxu0 %v275_v1 }
   0x9   :  { %267 = vmatpush3.bf16.msra.mxu0 %v266_v10  ;;  %v113_v12 = vld [vmem:[#allocation3] sm:$0xff]  ;;  %v236_v31 = vld [vmem:[#allocation4] ss:$0 sm:$0xff] }
   0xa   :  { %v31_v19 = vld [vmem:[#allocation2] sm:$0xff] }
   0xc   :  { %255 = vmatmul.mubr.msk.f32.vlgmr.msra.gmra.mrb[0].mxu0 %vm36_vm0, %v30_v0 }
  0x92   :  { %v117_v13 = vpop.xlane.xlu0 %116 }
  0x93   :  { %v118_v14 = vadd.f32 %v117_v13, %v113_v12 }
  0x95   :  { %120 = vst.msk [vmem:[#allocation3] sm:$0xff] %vm28_vm2, %v118_v14 }
  0x9c   :  { %v124_v15 = vld [vmem:[#allocation3] sm:$0xff] }
  0x9d   :  { %v125_v16 = vmul.f32 -0.008888889, %v124_v15 }
  0x9f   :  { %129 = vperm.xlu0 %272, %v125_v16  }
  0xdf   :  { %v106_v20 = vpop.f32.mrb[0].mxu0 }
  0xe0   :  { %v110_v21 = vadd.f32 %v106_v20, %v31_v19  ;;  %v256_v22 = vpop.f32.mrb[1].mxu0 }
  0xe2   :  { %112 = vst.msk [vmem:[#allocation2] sm:$0xff] %vm26_vm3, %v110_v21 }
  0xe9   :  { %v126_v23 = vld [vmem:[#allocation2] sm:$0xff] }
 0x11e   :  { %v130_v25 = vpop.permute.xlu0 %129 }
 0x11f   :  { %v132_v26 = vadd.f32 %v130_v25, %v126_v23 }
 0x121   :  { %v140_v27 = vadd.f32 %v235_v24, %v132_v26 }
 0x123   :  { %v141_v28 = vmin.f32 %v140_v27, 0.0 }
 0x125   :  { %v142_v29 = vmul.f32 1.442695, %v141_v28 }
 0x127   :  { %273 = vpow2.f32 %v142_v29 }
 0x131   :  { %v274_v30 = vpop.eup %273 }
 0x132   :  { %260 = vmatmul.mubr.msk.f32.vlgmr.msra.gmra.mrb[0].mxu1 %vm26_vm3, %v274_v30 }
 0x205   :  { %v225_v32 = vpop.f32.mrb[0].mxu1 }
 0x206   :  { %v226_v33 = vadd.f32 %v236_v31, %v225_v32  ;;  %v261_v34 = vpop.f32.mrb[1].mxu1 }
 0x208   :  { %229 = vst.msk [vmem:[%s349_s5] sm:$0xff] %vm28_vm2, %v226_v33 }

</bundles_post_ra>
